<compile_context>
chip_gen: v7x
topology: tpu7x:2x2x1
jax: 0.10.0
libtpu: 0.0.40
codegen_flags: <defaults>
</compile_context>

<pallas_src>
import functools

import jax
import jax.numpy as jnp
from jax.experimental import pallas as pl
from jax.experimental.pallas import tpu as pltpu


# ----------------------------------------------------------------------------
# Model dims (toy shapes consistent with the module)
# ----------------------------------------------------------------------------
N_BATCH = 2
C_IN = 4
H_IMG = 16
W_IMG = 16
C_MID = 8
N_OUT = 10
O_PAD = 128                        # FC output padded to one full lane width
LANE_W = W_IMG * C_MID             # 128: conv-output lane width, cols = (x, co)
K_CONV = 3 * (W_IMG + 2) * C_IN    # 216: folded (kh, x2, ci) contraction depth
K_FC = H_IMG * LANE_W              # 2048: flattened FC contraction depth
O_SUB = 8                          # output sublane padding (full (8,128) store)

# Layout invariants the kernel hard-wires (review correctness concern).
assert LANE_W == 128, "kernel assumes W*Cmid == 128 (one full lane width)"
assert O_PAD >= N_OUT


# ----------------------------------------------------------------------------
# Fused Pallas kernel: one image per grid step
# ----------------------------------------------------------------------------
def _fused_forward_kernel(x_ref, wb_ref, cb_ref, fw_ref, fb_ref, o_ref, flat_ref):
    """conv3x3(+bias,ReLU) -> flatten (NCHW order) -> linear, fully fused.

    x_ref : [1, H, 3*(W+2)*Cin]   bf16  kh-concatenated, zero-padded input rows
    wb_ref: [3*(W+2)*Cin, W*Cmid] bf16  banded conv weight (all 3 kh taps folded)
    cb_ref: [1, W*Cmid]           f32   conv bias tiled over x
    fw_ref: [H*W*Cmid, O_PAD]     bf16  FC weight in kernel-flat (y, x, c) row order
    fb_ref: [1, O_PAD]            f32   FC bias (zero padded)
    o_ref : [1, 8, O_PAD]         f32   logits (identical rows; cols >= n_out are pad)
    flat_ref: VMEM [8, H*W*Cmid]  f32   scratch for the (y,(x,c)) -> (1,(y,x,c)) relayout
    """
    h = x_ref.shape[1]
    lane_w = wb_ref.shape[-1]

    # ---- conv3x3 as ONE banded MXU matmul (K = 3*(W+2)*Cin = 216) -----------
    # rows = y, cols = (x, co): lane-dense 128-wide conv output.
    acc = jnp.dot(x_ref[0], wb_ref[...],
                  preferred_element_type=jnp.float32)            # [H, 128]
    hrow = jnp.maximum(acc + cb_ref[...], 0.0)                   # bias+ReLU (f32, v5e-safe)
    # TODO(synk): on v6e/v7x this epilogue could run in bf16 (bf16 VALU).

    # ---- relayout [H, 128] -> [8, H*128] via lane-aligned scratch stores ----
    # Each store is a full (8,128) unmasked tile (row broadcast over sublanes);
    # this uses the store/XLU slots while the MXU is otherwise idle.
    for y in range(h):
        flat_ref[:, y * lane_w:(y + 1) * lane_w] = jnp.broadcast_to(
            hrow[y:y + 1, :], (flat_ref.shape[0], lane_w))
    flat = flat_ref[...].astype(jnp.bfloat16)                    # [8, H*W*Cmid]

    # ---- FC: ONE [8, 2048] x [2048, 128] MXU matmul -------------------------
    logits = jnp.dot(flat, fw_ref[...],
                     preferred_element_type=jnp.float32) + fb_ref[...]
    o_ref[0] = logits.astype(o_ref.dtype)                        # full (8,128) store


def fused_forward(xcat, wb, cb_row, fw_flat, fb_pad):
    n, h, kc = xcat.shape
    lane_w = wb.shape[-1]
    o_pad = fb_pad.shape[-1]
    flops = 2 * n * h * kc * lane_w + 2 * n * (h * lane_w) * o_pad
    bytes_accessed = (xcat.size * 2 + wb.size * 2 + cb_row.size * 4
                      + fw_flat.size * 2 + fb_pad.size * 4 + n * O_SUB * o_pad * 4)
    return pl.pallas_call(
        _fused_forward_kernel,
        out_shape=jax.ShapeDtypeStruct((n, O_SUB, o_pad), jnp.float32),
        grid_spec=pltpu.PrefetchScalarGridSpec(
            num_scalar_prefetch=0,
            grid=(n,),                                   # batch axis -> 2 TCs on v7x
            in_specs=[
                pl.BlockSpec((1, h, kc), lambda i: (i, 0, 0)),       # per-image stream
                pl.BlockSpec((kc, lane_w), lambda i: (0, 0)),        # weights stay
                pl.BlockSpec((1, lane_w), lambda i: (0, 0)),         # VMEM-resident
                pl.BlockSpec((h * lane_w, o_pad), lambda i: (0, 0)), # across grid steps
                pl.BlockSpec((1, o_pad), lambda i: (0, 0)),
            ],
            out_specs=pl.BlockSpec((1, O_SUB, o_pad), lambda i: (i, 0, 0)),
            scratch_shapes=[pltpu.VMEM((O_SUB, h * lane_w), jnp.float32)],
        ),
        compiler_params=pltpu.CompilerParams(dimension_semantics=("parallel",)),
        cost_estimate=pl.CostEstimate(flops=flops, transcendentals=0,
                                      bytes_accessed=bytes_accessed),
    )(xcat, wb, cb_row, fw_flat, fb_pad)


# ----------------------------------------------------------------------------
# Synthetic inner module parameters + ONE-TIME kernel-layout preparation
# ----------------------------------------------------------------------------
def init_inner_params(c_in=C_IN, c_mid=C_MID, h=H_IMG, w=W_IMG, n_out=N_OUT):
    k = jax.random.PRNGKey(0)
    k1, k2, k3, k4 = jax.random.split(k, 4)
    conv_w = jax.random.normal(k1, (3, 3, c_in, c_mid), jnp.float32) * 0.1   # HWIO
    conv_b = jax.random.normal(k2, (c_mid,), jnp.float32) * 0.1
    # FC rows follow PyTorch NCHW flatten order: row = (c*H + y)*W + x
    fc_w = jax.random.normal(k3, (c_mid * h * w, n_out), jnp.float32) * 0.05
    fc_b = jax.random.normal(k4, (n_out,), jnp.float32) * 0.05
    return dict(conv_w=conv_w, conv_b=conv_b, fc_w=fc_w, fc_b=fc_b)


def prepare_kernel_params(params):
    """Rearrange weights into lane-dense kernel layouts.

    Called ONCE at "module construction" time (never inside the jitted forward),
    so the one-hot einsum / transposes / pads / bf16 casts are off the per-call
    path (review: biggest end-to-end win at these sizes).
    """
    conv_w, conv_b = params["conv_w"], params["conv_b"]
    fc_w, fc_b = params["fc_w"], params["fc_b"]
    kh, kw, c_in, c_mid = conv_w.shape
    h, w = H_IMG, W_IMG
    n_out = fc_w.shape[-1]
    assert kh == 3 and kw == 3 and w * c_mid == LANE_W

    # Banded conv weight with ALL kh taps folded in:
    #   wb[(t*(W+2) + x2)*Cin + ci, x*Cmid + co] = conv_w[t, x2 - x, ci, co]
    x2 = jnp.arange(w + 2)[None, :, None]
    x = jnp.arange(w)[None, None, :]
    kw_i = jnp.arange(kw)[:, None, None]
    sel = (x2 == x + kw_i).astype(jnp.float32)                  # [3, W+2, W]
    wb = jnp.einsum("wax,hwio->haixo", sel, conv_w)             # [3, W+2, Cin, W, Cmid]
    wb = wb.reshape(kh * (w + 2) * c_in, w * c_mid).astype(jnp.bfloat16)

    cb_row = jnp.tile(conv_b.reshape(1, c_mid), (1, w))         # [1, W*Cmid], cols=(x,c)

    # FC weight in the kernel-flat row order (y, x, c) that the in-kernel
    # relayout produces, derived from PyTorch's NCHW flatten order (c, y, x).
    fw4 = fc_w.reshape(c_mid, h, w, n_out)                      # [c, y, x, o]
    fw_flat = jnp.transpose(fw4, (1, 2, 0, 3)).reshape(h * w * c_mid, n_out)
    fw_flat = jnp.pad(fw_flat, ((0, 0), (0, O_PAD - n_out))).astype(jnp.bfloat16)

    fb_pad = jnp.pad(fc_b.reshape(1, n_out), ((0, 0), (0, O_PAD - n_out)))
    return dict(wb=wb, cb_row=cb_row, fw_flat=fw_flat, fb_pad=fb_pad)


# ----------------------------------------------------------------------------
# Inner module + WrappedModel (pure delegation, as in the PyTorch spec)
# ----------------------------------------------------------------------------
def inner_module_forward(kparams, x_nchw, y, is_train=False):
    n, c, h, w = x_nchw.shape
    assert (c, h, w) == (C_IN, H_IMG, W_IMG)
    # NCHW -> NHWC, zero pad, merge (x, c) lanes, and pre-concatenate the 3
    # kh-shifted row slices: one relayout fusion; activations cast to bf16 ONCE.
    # (bf16 activations+weights on the MXU; ~1e-2 drift vs the f32 reference.)
    x_nhwc = jnp.transpose(x_nchw, (0, 2, 3, 1))
    xp = jnp.pad(x_nhwc, ((0, 0), (1, 1), (1, 1), (0, 0)))
    xp_rows = xp.reshape(n, h + 2, (w + 2) * c)
    xcat = jnp.concatenate([xp_rows[:, t:t + h, :] for t in range(3)],
                           axis=-1).astype(jnp.bfloat16)        # [N, H, 3*(W+2)*Cin]
    out = fused_forward(xcat, kparams["wb"], kparams["cb_row"],
                        kparams["fw_flat"], kparams["fb_pad"])
    logits = out[:, 0, :N_OUT]
    if is_train:
        return jnp.mean((logits - y) ** 2)
    return logits


def wrapped_model_forward(kparams, x, y, is_train=False):
    """Exact semantics of WrappedModel.forward: delegate to the inner module."""
    return inner_module_forward(kparams, x, y, is_train=is_train)


# ----------------------------------------------------------------------------
# Pure-JAX reference (f32) for a correctness check of the fused kernel
# ----------------------------------------------------------------------------
def reference_forward(params, x_nchw, y, is_train=False):
    x_nhwc = jnp.transpose(x_nchw, (0, 2, 3, 1))
    xp = jnp.pad(x_nhwc, ((0, 0), (1, 1), (1, 1), (0, 0)))
    conv = jnp.zeros(x_nhwc.shape[:3] + (params["conv_w"].shape[-1],), jnp.float32)
    for kh in range(3):
        for kw in range(3):
            conv = conv + jnp.einsum(
                "nhwi,io->nhwo",
                xp[:, kh:kh + H_IMG, kw:kw + W_IMG, :],
                params["conv_w"][kh, kw])
    conv = jnp.maximum(conv + params["conv_b"], 0.0)
    flat = jnp.transpose(conv, (0, 3, 1, 2)).reshape(x_nchw.shape[0], -1)  # NCHW flatten
    logits = flat @ params["fc_w"] + params["fc_b"]
    if is_train:
        return jnp.mean((logits - y) ** 2)
    return logits


# ----------------------------------------------------------------------------
if __name__ == "__main__":
    key = jax.random.PRNGKey(0)
    kx, ky = jax.random.split(key)
    x = jax.random.normal(kx, (N_BATCH, C_IN, H_IMG, W_IMG), jnp.float32)  # NCHW
    y = jax.random.normal(ky, (N_BATCH, N_OUT), jnp.float32)

    params = init_inner_params()
    kparams = prepare_kernel_params(params)   # once, at init — hoisted out of forward

    fwd = jax.jit(functools.partial(wrapped_model_forward, is_train=False))
    out = fwd(kparams, x, y)
    jax.block_until_ready(out)

    assert out.shape == (N_BATCH, N_OUT), out.shape
    assert out.dtype == jnp.float32

    ref = reference_forward(params, x, y, is_train=False)
    max_err = float(jnp.max(jnp.abs(out - ref)))
    assert max_err < 5e-2, f"mismatch vs reference: {max_err}"

    # is_train=True path (wrapper delegation returns the MSE loss).
    loss_fn = jax.jit(functools.partial(wrapped_model_forward, is_train=True))
    loss = loss_fn(kparams, x, y)
    jax.block_until_ready(loss)
    ref_loss = reference_forward(params, x, y, is_train=True)
    assert abs(float(loss) - float(ref_loss)) < 5e-2 * max(1.0, abs(float(ref_loss)))

    print("KERNEL_OK")
</pallas_src>

<mosaic_0001>
module attributes {stable_mosaic.version = 11 : i64} {
  func.func @_fused_forward_kernel(%arg0: i32, %arg1: memref<1x16x216xbf16, #tpu.memory_space<vmem>>, %arg2: memref<216x128xbf16, #tpu.memory_space<vmem>>, %arg3: memref<1x128xf32, #tpu.memory_space<vmem>>, %arg4: memref<2048x128xbf16, #tpu.memory_space<vmem>>, %arg5: memref<1x128xf32, #tpu.memory_space<vmem>>, %arg6: memref<1x8x128xf32, #tpu.memory_space<vmem>>, %arg7: memref<8x2048xf32, #tpu.memory_space<vmem>>) attributes {dimension_semantics = [#tpu.dimension_semantics<parallel>], iteration_bounds = array<i64: 2>, scalar_prefetch = 0 : i64, scratch_operands = 1 : i64, tpu.core_type = #tpu.core_type<tc>, window_params = [{transform_indices = @transform_0, window_bounds = array<i64: 1, 16, 216>}, {pipeline_mode = #tpu.pipeline_mode<synchronous>, transform_indices = @transform_1, window_bounds = array<i64: 216, 128>}, {pipeline_mode = #tpu.pipeline_mode<synchronous>, transform_indices = @transform_2, window_bounds = array<i64: 1, 128>}, {pipeline_mode = #tpu.pipeline_mode<synchronous>, transform_indices = @transform_3, window_bounds = array<i64: 2048, 128>}, {pipeline_mode = #tpu.pipeline_mode<synchronous>, transform_indices = @transform_4, window_bounds = array<i64: 1, 128>}, {transform_indices = @transform_5, window_bounds = array<i64: 1, 8, 128>}]} {
    %c0 = arith.constant 0 : index
    %c0_0 = arith.constant 0 : index
    %c0_1 = arith.constant 0 : index
    %0 = vector.load %arg1[%c0, %c0_0, %c0_1] : memref<1x16x216xbf16, #tpu.memory_space<vmem>>, vector<1x16x216xbf16>
    %1 = vector.shape_cast %0 : vector<1x16x216xbf16> to vector<16x216xbf16>
    %c0_2 = arith.constant 0 : index
    %c0_3 = arith.constant 0 : index
    %2 = vector.load %arg2[%c0_2, %c0_3] : memref<216x128xbf16, #tpu.memory_space<vmem>>, vector<216x128xbf16>
    %cst = arith.constant dense<0.000000e+00> : vector<16x128xf32>
    %3 = tpu.matmul %1, %2, %cst {dimension_numbers = #tpu.dot_dimension_numbers<[1], [0], [0], [1], [0, 0, 1, 1], [], []>} : vector<16x216xbf16>, vector<216x128xbf16>, vector<16x128xf32> -> vector<16x128xf32>
    %c0_4 = arith.constant 0 : index
    %c0_5 = arith.constant 0 : index
    %4 = vector.load %arg3[%c0_4, %c0_5] : memref<1x128xf32, #tpu.memory_space<vmem>>, vector<1x128xf32>
    %5 = vector.broadcast %4 : vector<1x128xf32> to vector<16x128xf32>
    %6 = arith.addf %3, %5 : vector<16x128xf32>
    %cst_6 = arith.constant 0.000000e+00 : f32
    %7 = vector.broadcast %cst_6 : f32 to vector<16x128xf32>
    %8 = arith.maximumf %6, %7 : vector<16x128xf32>
    %9 = vector.extract_strided_slice %8 {offsets = [0, 0], sizes = [1, 128], strides = [1, 1]} : vector<16x128xf32> to vector<1x128xf32>
    %10 = vector.shape_cast %9 : vector<1x128xf32> to vector<1x128xf32>
    %11 = vector.broadcast %10 : vector<1x128xf32> to vector<8x128xf32>
    %c0_7 = arith.constant 0 : index
    %c0_8 = arith.constant 0 : index
    %12 = vector.load %arg7[%c0_7, %c0_8] : memref<8x2048xf32, #tpu.memory_space<vmem>>, vector<8x128xf32>
    tpu.vector_store %arg7[%c0_7, %c0_8], %11 {strides = array<i32>} : memref<8x2048xf32, #tpu.memory_space<vmem>>, vector<8x128xf32>,
    %13 = vector.extract_strided_slice %8 {offsets = [1, 0], sizes = [1, 128], strides = [1, 1]} : vector<16x128xf32> to vector<1x128xf32>
    %14 = vector.shape_cast %13 : vector<1x128xf32> to vector<1x128xf32>
    %15 = vector.broadcast %14 : vector<1x128xf32> to vector<8x128xf32>
    %c0_9 = arith.constant 0 : index
    %c128 = arith.constant 128 : index
    %16 = vector.load %arg7[%c0_9, %c128] : memref<8x2048xf32, #tpu.memory_space<vmem>>, vector<8x128xf32>
    tpu.vector_store %arg7[%c0_9, %c128], %15 {strides = array<i32>} : memref<8x2048xf32, #tpu.memory_space<vmem>>, vector<8x128xf32>,
    %17 = vector.extract_strided_slice %8 {offsets = [2, 0], sizes = [1, 128], strides = [1, 1]} : vector<16x128xf32> to vector<1x128xf32>
    %18 = vector.shape_cast %17 : vector<1x128xf32> to vector<1x128xf32>
    %19 = vector.broadcast %18 : vector<1x128xf32> to vector<8x128xf32>
    %c0_10 = arith.constant 0 : index
    %c256 = arith.constant 256 : index
    %20 = vector.load %arg7[%c0_10, %c256] : memref<8x2048xf32, #tpu.memory_space<vmem>>, vector<8x128xf32>
    tpu.vector_store %arg7[%c0_10, %c256], %19 {strides = array<i32>} : memref<8x2048xf32, #tpu.memory_space<vmem>>, vector<8x128xf32>,
    %21 = vector.extract_strided_slice %8 {offsets = [3, 0], sizes = [1, 128], strides = [1, 1]} : vector<16x128xf32> to vector<1x128xf32>
    %22 = vector.shape_cast %21 : vector<1x128xf32> to vector<1x128xf32>
    %23 = vector.broadcast %22 : vector<1x128xf32> to vector<8x128xf32>
    %c0_11 = arith.constant 0 : index
    %c384 = arith.constant 384 : index
    %24 = vector.load %arg7[%c0_11, %c384] : memref<8x2048xf32, #tpu.memory_space<vmem>>, vector<8x128xf32>
    tpu.vector_store %arg7[%c0_11, %c384], %23 {strides = array<i32>} : memref<8x2048xf32, #tpu.memory_space<vmem>>, vector<8x128xf32>,
    %25 = vector.extract_strided_slice %8 {offsets = [4, 0], sizes = [1, 128], strides = [1, 1]} : vector<16x128xf32> to vector<1x128xf32>
    %26 = vector.shape_cast %25 : vector<1x128xf32> to vector<1x128xf32>
    %27 = vector.broadcast %26 : vector<1x128xf32> to vector<8x128xf32>
    %c0_12 = arith.constant 0 : index
    %c512 = arith.constant 512 : index
    %28 = vector.load %arg7[%c0_12, %c512] : memref<8x2048xf32, #tpu.memory_space<vmem>>, vector<8x128xf32>
    tpu.vector_store %arg7[%c0_12, %c512], %27 {strides = array<i32>} : memref<8x2048xf32, #tpu.memory_space<vmem>>, vector<8x128xf32>,
    %29 = vector.extract_strided_slice %8 {offsets = [5, 0], sizes = [1, 128], strides = [1, 1]} : vector<16x128xf32> to vector<1x128xf32>
    %30 = vector.shape_cast %29 : vector<1x128xf32> to vector<1x128xf32>
    %31 = vector.broadcast %30 : vector<1x128xf32> to vector<8x128xf32>
    %c0_13 = arith.constant 0 : index
    %c640 = arith.constant 640 : index
    %32 = vector.load %arg7[%c0_13, %c640] : memref<8x2048xf32, #tpu.memory_space<vmem>>, vector<8x128xf32>
    tpu.vector_store %arg7[%c0_13, %c640], %31 {strides = array<i32>} : memref<8x2048xf32, #tpu.memory_space<vmem>>, vector<8x128xf32>,
    %33 = vector.extract_strided_slice %8 {offsets = [6, 0], sizes = [1, 128], strides = [1, 1]} : vector<16x128xf32> to vector<1x128xf32>
    %34 = vector.shape_cast %33 : vector<1x128xf32> to vector<1x128xf32>
    %35 = vector.broadcast %34 : vector<1x128xf32> to vector<8x128xf32>
    %c0_14 = arith.constant 0 : index
    %c768 = arith.constant 768 : index
    %36 = vector.load %arg7[%c0_14, %c768] : memref<8x2048xf32, #tpu.memory_space<vmem>>, vector<8x128xf32>
    tpu.vector_store %arg7[%c0_14, %c768], %35 {strides = array<i32>} : memref<8x2048xf32, #tpu.memory_space<vmem>>, vector<8x128xf32>,
    %37 = vector.extract_strided_slice %8 {offsets = [7, 0], sizes = [1, 128], strides = [1, 1]} : vector<16x128xf32> to vector<1x128xf32>
    %38 = vector.shape_cast %37 : vector<1x128xf32> to vector<1x128xf32>
    %39 = vector.broadcast %38 : vector<1x128xf32> to vector<8x128xf32>
    %c0_15 = arith.constant 0 : index
    %c896 = arith.constant 896 : index
    %40 = vector.load %arg7[%c0_15, %c896] : memref<8x2048xf32, #tpu.memory_space<vmem>>, vector<8x128xf32>
    tpu.vector_store %arg7[%c0_15, %c896], %39 {strides = array<i32>} : memref<8x2048xf32, #tpu.memory_space<vmem>>, vector<8x128xf32>,
    %41 = vector.extract_strided_slice %8 {offsets = [8, 0], sizes = [1, 128], strides = [1, 1]} : vector<16x128xf32> to vector<1x128xf32>
    %42 = vector.shape_cast %41 : vector<1x128xf32> to vector<1x128xf32>
    %43 = vector.broadcast %42 : vector<1x128xf32> to vector<8x128xf32>
    %c0_16 = arith.constant 0 : index
    %c1024 = arith.constant 1024 : index
    %44 = vector.load %arg7[%c0_16, %c1024] : memref<8x2048xf32, #tpu.memory_space<vmem>>, vector<8x128xf32>
    tpu.vector_store %arg7[%c0_16, %c1024], %43 {strides = array<i32>} : memref<8x2048xf32, #tpu.memory_space<vmem>>, vector<8x128xf32>,
    %45 = vector.extract_strided_slice %8 {offsets = [9, 0], sizes = [1, 128], strides = [1, 1]} : vector<16x128xf32> to vector<1x128xf32>
    %46 = vector.shape_cast %45 : vector<1x128xf32> to vector<1x128xf32>
    %47 = vector.broadcast %46 : vector<1x128xf32> to vector<8x128xf32>
    %c0_17 = arith.constant 0 : index
    %c1152 = arith.constant 1152 : index
    %48 = vector.load %arg7[%c0_17, %c1152] : memref<8x2048xf32, #tpu.memory_space<vmem>>, vector<8x128xf32>
    tpu.vector_store %arg7[%c0_17, %c1152], %47 {strides = array<i32>} : memref<8x2048xf32, #tpu.memory_space<vmem>>, vector<8x128xf32>,
    %49 = vector.extract_strided_slice %8 {offsets = [10, 0], sizes = [1, 128], strides = [1, 1]} : vector<16x128xf32> to vector<1x128xf32>
    %50 = vector.shape_cast %49 : vector<1x128xf32> to vector<1x128xf32>
    %51 = vector.broadcast %50 : vector<1x128xf32> to vector<8x128xf32>
    %c0_18 = arith.constant 0 : index
    %c1280 = arith.constant 1280 : index
    %52 = vector.load %arg7[%c0_18, %c1280] : memref<8x2048xf32, #tpu.memory_space<vmem>>, vector<8x128xf32>
    tpu.vector_store %arg7[%c0_18, %c1280], %51 {strides = array<i32>} : memref<8x2048xf32, #tpu.memory_space<vmem>>, vector<8x128xf32>,
    %53 = vector.extract_strided_slice %8 {offsets = [11, 0], sizes = [1, 128], strides = [1, 1]} : vector<16x128xf32> to vector<1x128xf32>
    %54 = vector.shape_cast %53 : vector<1x128xf32> to vector<1x128xf32>
    %55 = vector.broadcast %54 : vector<1x128xf32> to vector<8x128xf32>
    %c0_19 = arith.constant 0 : index
    %c1408 = arith.constant 1408 : index
    %56 = vector.load %arg7[%c0_19, %c1408] : memref<8x2048xf32, #tpu.memory_space<vmem>>, vector<8x128xf32>
    tpu.vector_store %arg7[%c0_19, %c1408], %55 {strides = array<i32>} : memref<8x2048xf32, #tpu.memory_space<vmem>>, vector<8x128xf32>,
    %57 = vector.extract_strided_slice %8 {offsets = [12, 0], sizes = [1, 128], strides = [1, 1]} : vector<16x128xf32> to vector<1x128xf32>
    %58 = vector.shape_cast %57 : vector<1x128xf32> to vector<1x128xf32>
    %59 = vector.broadcast %58 : vector<1x128xf32> to vector<8x128xf32>
    %c0_20 = arith.constant 0 : index
    %c1536 = arith.constant 1536 : index
    %60 = vector.load %arg7[%c0_20, %c1536] : memref<8x2048xf32, #tpu.memory_space<vmem>>, vector<8x128xf32>
    tpu.vector_store %arg7[%c0_20, %c1536], %59 {strides = array<i32>} : memref<8x2048xf32, #tpu.memory_space<vmem>>, vector<8x128xf32>,
    %61 = vector.extract_strided_slice %8 {offsets = [13, 0], sizes = [1, 128], strides = [1, 1]} : vector<16x128xf32> to vector<1x128xf32>
    %62 = vector.shape_cast %61 : vector<1x128xf32> to vector<1x128xf32>
    %63 = vector.broadcast %62 : vector<1x128xf32> to vector<8x128xf32>
    %c0_21 = arith.constant 0 : index
    %c1664 = arith.constant 1664 : index
    %64 = vector.load %arg7[%c0_21, %c1664] : memref<8x2048xf32, #tpu.memory_space<vmem>>, vector<8x128xf32>
    tpu.vector_store %arg7[%c0_21, %c1664], %63 {strides = array<i32>} : memref<8x2048xf32, #tpu.memory_space<vmem>>, vector<8x128xf32>,
    %65 = vector.extract_strided_slice %8 {offsets = [14, 0], sizes = [1, 128], strides = [1, 1]} : vector<16x128xf32> to vector<1x128xf32>
    %66 = vector.shape_cast %65 : vector<1x128xf32> to vector<1x128xf32>
    %67 = vector.broadcast %66 : vector<1x128xf32> to vector<8x128xf32>
    %c0_22 = arith.constant 0 : index
    %c1792 = arith.constant 1792 : index
    %68 = vector.load %arg7[%c0_22, %c1792] : memref<8x2048xf32, #tpu.memory_space<vmem>>, vector<8x128xf32>
    tpu.vector_store %arg7[%c0_22, %c1792], %67 {strides = array<i32>} : memref<8x2048xf32, #tpu.memory_space<vmem>>, vector<8x128xf32>,
    %69 = vector.extract_strided_slice %8 {offsets = [15, 0], sizes = [1, 128], strides = [1, 1]} : vector<16x128xf32> to vector<1x128xf32>
    %70 = vector.shape_cast %69 : vector<1x128xf32> to vector<1x128xf32>
    %71 = vector.broadcast %70 : vector<1x128xf32> to vector<8x128xf32>
    %c0_23 = arith.constant 0 : index
    %c1920 = arith.constant 1920 : index
    %72 = vector.load %arg7[%c0_23, %c1920] : memref<8x2048xf32, #tpu.memory_space<vmem>>, vector<8x128xf32>
    tpu.vector_store %arg7[%c0_23, %c1920], %71 {strides = array<i32>} : memref<8x2048xf32, #tpu.memory_space<vmem>>, vector<8x128xf32>,
    %c0_24 = arith.constant 0 : index
    %c0_25 = arith.constant 0 : index
    %73 = vector.load %arg7[%c0_24, %c0_25] : memref<8x2048xf32, #tpu.memory_space<vmem>>, vector<8x2048xf32>
    %74 = arith.truncf %73 : vector<8x2048xf32> to vector<8x2048xbf16>
    %c0_26 = arith.constant 0 : index
    %c0_27 = arith.constant 0 : index
    %75 = vector.load %arg4[%c0_26, %c0_27] : memref<2048x128xbf16, #tpu.memory_space<vmem>>, vector<2048x128xbf16>
    %cst_28 = arith.constant dense<0.000000e+00> : vector<8x128xf32>
    %76 = tpu.matmul %74, %75, %cst_28 {dimension_numbers = #tpu.dot_dimension_numbers<[1], [0], [0], [1], [0, 0, 1, 1], [], []>} : vector<8x2048xbf16>, vector<2048x128xbf16>, vector<8x128xf32> -> vector<8x128xf32>
    %c0_29 = arith.constant 0 : index
    %c0_30 = arith.constant 0 : index
    %77 = vector.load %arg5[%c0_29, %c0_30] : memref<1x128xf32, #tpu.memory_space<vmem>>, vector<1x128xf32>
    %78 = vector.broadcast %77 : vector<1x128xf32> to vector<8x128xf32>
    %79 = arith.addf %76, %78 : vector<8x128xf32>
    %c0_31 = arith.constant 0 : index
    %c0_32 = arith.constant 0 : index
    %c0_33 = arith.constant 0 : index
    %80 = vector.load %arg6[%c0_31, %c0_32, %c0_33] : memref<1x8x128xf32, #tpu.memory_space<vmem>>, vector<1x8x128xf32>
    %81 = vector.shape_cast %80 : vector<1x8x128xf32> to vector<8x128xf32>
    %82 = vector.shape_cast %79 : vector<8x128xf32> to vector<1x8x128xf32>
    tpu.vector_store %arg6[%c0_31, %c0_32, %c0_33], %82 {strides = array<i32>} : memref<1x8x128xf32, #tpu.memory_space<vmem>>, vector<1x8x128xf32>,
    return
  }
  func.func @transform_0(%arg0: i32) -> (i32, i32, i32) {
    %c0_i32 = arith.constant 0 : i32
    %c0_i32_0 = arith.constant 0 : i32
    %c0_i32_1 = arith.constant 0 : i32
    return %arg0, %c0_i32, %c0_i32_0 : i32, i32, i32
  }
  func.func @transform_1(%arg0: i32) -> (i32, i32) {
    %c0_i32 = arith.constant 0 : i32
    %c0_i32_0 = arith.constant 0 : i32
    %c0_i32_1 = arith.constant 0 : i32
    return %c0_i32, %c0_i32_0 : i32, i32
  }
  func.func @transform_2(%arg0: i32) -> (i32, i32) {
    %c0_i32 = arith.constant 0 : i32
    %c0_i32_0 = arith.constant 0 : i32
    %c0_i32_1 = arith.constant 0 : i32
    return %c0_i32, %c0_i32_0 : i32, i32
  }
  func.func @transform_3(%arg0: i32) -> (i32, i32) {
    %c0_i32 = arith.constant 0 : i32
    %c0_i32_0 = arith.constant 0 : i32
    %c0_i32_1 = arith.constant 0 : i32
    return %c0_i32, %c0_i32_0 : i32, i32
  }
  func.func @transform_4(%arg0: i32) -> (i32, i32) {
    %c0_i32 = arith.constant 0 : i32
    %c0_i32_0 = arith.constant 0 : i32
    %c0_i32_1 = arith.constant 0 : i32
    return %c0_i32, %c0_i32_0 : i32, i32
  }
  func.func @transform_5(%arg0: i32) -> (i32, i32, i32) {
    %c0_i32 = arith.constant 0 : i32
    %c0_i32_0 = arith.constant 0 : i32
    %c0_i32_1 = arith.constant 0 : i32
    return %arg0, %c0_i32, %c0_i32_0 : i32, i32, i32
  }
}

</mosaic_0001>

<bundles_post_ra>
// kernel: wrapped_model_forward.1
= control target key start
LH: loop header
LB: loop body
LE: loop exit
PB: predicated region body
PF: predicated region fallthrough
CT: control target
= control target key end

     0   :  { %s2445_s18 = smov 0   ;;  %s2986_s0 = inlined_call_operand.vmem [shape: bf16[2,16,216], index: 0, kind: input, shape index: {}]   ;;  %s2987_s1 = inlined_call_operand.vmem [shape: bf16[216,128], index: 1, kind: input, shape index: {}]   ;;  %s2988_s2 = inlined_call_operand.vmem [shape: f32[1,128], index: 2, kind: input, shape index: {}]   ;;  %s2989_s3 = inlined_call_operand.vmem [shape: bf16[2048,128], index: 3, kind: input, shape index: {}]   ;;  %s2990_s4 = inlined_call_operand.vmem [shape: f32[1,128], index: 4, kind: input, shape index: {}]   ;;  %s2991_s5 = inlined_call_operand.vmem [shape: f32[2,8,128], index: 5, kind: output, shape index: {}]  }
   0x1 LB: > { %s1918_s19 = sadd.s32 4294967295, %s2412_s18   ;;  %p1922_p0 = scmp.ge.s32.totalorder %s2412_s18, 1  ;;  %s2412_s18 = sphi %s2445_s18, %s15_s18  }
   0x2   : > { %p187_p1 = scmp.lt.s32.totalorder %s2412_s18, 3 }
   0x4   : > { %p188_p2 = pnand %p1922_p0, %p187_p1 }
   0x5   : > { %v2261_v0 = vld [vmem:[%s2987_s1] sm:$0xff] (!%p188_p2)   ;;  %v2414_v1 = vmov (!%p188_p2), 0   ;;  %v2262_v2 = vld [vmem:[%s2987_s1 + $0x8] sm:$0xff] (!%p188_p2)   ;;  %p214_p3 = scmp.lt.s32.totalorder (!%p188_p2), %s1918_s19, 1  ;;  %v2263_v3 = vld [vmem:[%s2987_s1 + $0x10] sm:$0xff] (!%p188_p2)   ;;  %vm350_vm0 = vcmask (!%p188_p2), 719872   ;;  %v401_v52 = vlaneseq (!%p188_p2) }
   0x6   : > { %191 = sbr.rel (%p188_p2) target bundleno = 629 (0x275), region = 40  ;;  %358 = vmatprep.subr.bf16.mxu0 (!%p188_p2), %v2414_v1  ;;  %v2264_v4 = vld [vmem:[%s2987_s1 + $0x18] sm:$0xff] (!%p188_p2)   ;;  %v2265_v5 = vld [vmem:[%s2987_s1 + $0x20] sm:$0xff] (!%p188_p2)   ;;  %v2266_v9 = vld [vmem:[%s2987_s1 + $0x28] sm:$0xff] (!%p188_p2)   ;;  %vm354_vm1 = vcmask (!%p188_p2), 1043456  }
   0x7   : > { %359 = vmatpush1.bf16.msra.mxu0 (!%p188_p2), %v2261_v0  ;;  %v2278_v7 = vld [vmem:[%s2989_s3 + $0x40] sm:$0xff] (!%p188_p2)   ;;  %v2282_v10 = vld [vmem:[%s2989_s3 + $0x48] sm:$0xff] (!%p188_p2)   ;;  %v2267_v12 = vld [vmem:[%s2987_s1 + $0x30] sm:$0xff] (!%p188_p2)   ;;  %v2621_v53 = vshrl.u32 (!%p188_p2), %v401_v52, 7 }
   0x8   : > { %360 = vmatprep.subr.bf16.mxu0 (!%p188_p2), %v2414_v1  ;;  %2076 = vmatprep.subr.bf16.mxu1 (!%p188_p2), %v2278_v7  ;;  %v2280_v8 = vld [vmem:[%s2989_s3] sm:$0xff] (!%p188_p2)   ;;  %v2284_v11 = vld [vmem:[%s2989_s3 + $0x8] sm:$0xff] (!%p188_p2)   ;;  %v2286_v13 = vld [vmem:[%s2989_s3 + $0x50] sm:$0xff] (!%p188_p2)  }
   0x9   : > { %2077 = vmatpush3.bf16.msra.mxu1 (!%p188_p2), %v2280_v8  ;;  %v2288_v14 = vld [vmem:[%s2989_s3 + $0x10] sm:$0xff] (!%p188_p2)   ;;  %v2268_v15 = vld [vmem:[%s2987_s1 + $0x38] sm:$0xff] (!%p188_p2)   ;;  %v2269_v18 = vld [vmem:[%s2987_s1 + $0x40] sm:$0xff] (!%p188_p2)   ;;  %v408_v58 = vsub.s32 (!%p188_p2), 1, %v2621_v53  ;;  %v428_v59 = vsub.s32 (!%p188_p2), 5, %v2621_v53  ;;  %v403_v60 = vsub.s32 (!%p188_p2), 0, %v2621_v53 }
   0xa   : > { %2078 = vmatprep.subr.bf16.mxu1 (!%p188_p2), %v2282_v10  ;;  %v2290_v16 = vld [vmem:[%s2989_s3 + $0x58] sm:$0xff] (!%p188_p2)   ;;  %v2294_v19 = vld [vmem:[%s2989_s3 + $0x60] sm:$0xff] (!%p188_p2)   ;;  %v2270_v20 = vld [vmem:[%s2987_s1 + $0x48] sm:$0xff] (!%p188_p2)   ;;  %v423_v62 = vsub.s32 (!%p188_p2), 4, %v2621_v53  ;;  %v418_v63 = vsub.s32 (!%p188_p2), 3, %v2621_v53 }
   0xb   : > { %361 = vmatpush1.bf16.msra.mxu0 (!%p188_p2), %v2262_v2  ;;  %v2292_v17 = vld [vmem:[%s2989_s3 + $0x18] sm:$0xff] (!%p188_p2)   ;;  %v2296_v21 = vld [vmem:[%s2989_s3 + $0x20] sm:$0xff] (!%p188_p2)   ;;  %v2274_v22 = vld [vmem:[%s2987_s1 + $0x68] ss:$0 sps:$4 sm:$0xff] (!%p188_p2)  }
   0xc   : > { %362 = vmatprep.subr.bf16.mxu0 (!%p188_p2), %v2414_v1  ;;  %v2298_v23 = vld [vmem:[%s2989_s3 + $0x68] sm:$0xff] (!%p188_p2)   ;;  %v2271_v25 = vld [vmem:[%s2987_s1 + $0x50] sm:$0xff] (!%p188_p2)   ;;  %v356_v26 = vsel (!%p188_p2), %vm354_vm1, %v2274_v22, 0  ;;  %v2272_v27 = vld [vmem:[%s2987_s1 + $0x58] sm:$0xff] (!%p188_p2)   ;;  %v438_v22 = vsub.s32 (!%p188_p2), 7, %v2621_v53 }
   0xd   : > { %s2993_s19 = smov (!%p214_p3, %s1918_s19), 1  ;;  %2079 = vmatpush3.bf16.msra.mxu1 %v2284_v11  ;;  %v2300_v24 = vld [vmem:[%s2989_s3 + $0x28] sm:$0xff]   ;;  %v2273_v28 = vld [vmem:[%s2987_s1 + $0x60] sm:$0xff]   ;;  %v2287_v34 = vld [vmem:[%s2989_s3 + $0x150] sm:$0xff]  }
   0xe   : > { %s2075_s26 = sshll.u32 %s2993_s19, 4  ;;  %2080 = vmatprep.subr.bf16.mxu1 %v2286_v13  ;;  %v2279_v29 = vld [vmem:[%s2989_s3 + $0x140] sm:$0xff]   ;;  %v2283_v32 = vld [vmem:[%s2989_s3 + $0x148] sm:$0xff]   ;;  %v2289_v35 = vld [vmem:[%s2989_s3 + $0x110] sm:$0xff]   ;;  %s1925_s13 = sshll.u32 %s2993_s19, 3 }
   0xf   : > { %363 = vmatpush1.bf16.msra.mxu0 %v2263_v3  ;;  %s2475_s6 = scalar_lea.vmem %s2986_s0, %s2075_s26  ;;  %v2281_v31 = vld [vmem:[%s2989_s3 + $0x100] sm:$0xff]   ;;  %v2285_v33 = vld [vmem:[%s2989_s3 + $0x108] sm:$0xff]   ;;  %v2291_v36 = vld [vmem:[%s2989_s3 + $0x158] sm:$0xff]   ;;  %s222_s16 = scalar_lea.vmem %s2991_s5, %s1925_s13 }
  0x10   : > { %364 = vmatprep.subr.bf16.mxu0 %v2414_v1  ;;  %v2277_v6 = vld [vmem:[%s2475_s6 + $0x4] ss:$8 sps:$4 sm:$0xff]   ;;  %v2275_v30 = vld [vmem:[%s2475_s6] ss:$8 sps:$4 sm:$0xff]   ;;  %v2293_v37 = vld [vmem:[%s2989_s3 + $0x118] sm:$0xff]  }
  0x11   : > { %1943 = vmatprep.mubr.msk.bf16.mxu0 %vm350_vm0, %v2277_v6  ;;  %2081 = vmatpush3.bf16.msra.mxu1 %v2288_v14  ;;  %v2295_v38 = vld [vmem:[%s2989_s3 + $0x160] sm:$0xff]   ;;  %v2299_v40 = vld [vmem:[%s2989_s3 + $0x168] sm:$0xff]   ;;  %v2302_v42 = vld [vmem:[%s2989_s3 + $0x70] sm:$0xff]  }
  0x12   : > { %2082 = vmatprep.subr.bf16.mxu1 %v2290_v16  ;;  %v2297_v39 = vld [vmem:[%s2989_s3 + $0x120] sm:$0xff]   ;;  %v2301_v41 = vld [vmem:[%s2989_s3 + $0x128] sm:$0xff]   ;;  %v2303_v43 = vld [vmem:[%s2989_s3 + $0x170] sm:$0xff]  }
  0x13   : > { %365 = vmatpush1.bf16.msra.mxu0 %v2264_v4  ;;  %v2304_v44 = vld [vmem:[%s2989_s3 + $0x30] sm:$0xff]   ;;  %v2306_v46 = vld [vmem:[%s2989_s3 + $0x78] sm:$0xff]   ;;  %v2310_v50 = vld [vmem:[%s2989_s3 + $0xc0] sm:$0xff]  }
  0x14   : > { %366 = vmatprep.subr.bf16.mxu0 %v2414_v1  ;;  %v2305_v45 = vld [vmem:[%s2989_s3 + $0x130] sm:$0xff]   ;;  %v2307_v47 = vld [vmem:[%s2989_s3 + $0x178] sm:$0xff]   ;;  %v2311_v51 = vld [vmem:[%s2989_s3 + $0x240] sm:$0xff]  }
  0x15   : > { %2083 = vmatpush3.bf16.msra.mxu1 %v2292_v17  ;;  %v2308_v48 = vld [vmem:[%s2989_s3 + $0x38] sm:$0xff]   ;;  %v1926_v54 = vld [vmem:[%s2988_s2] ss:$0 sm:$0xff] }
  0x16   : > { %2084 = vmatprep.subr.bf16.mxu1 %v2294_v19  ;;  %v2309_v49 = vld [vmem:[%s2989_s3 + $0x138] sm:$0xff]   ;;  %v2312_v13 = vld [vmem:[%s2989_s3 + $0x80] sm:$0xff]   ;;  %v2315_v19 = vld [vmem:[%s2989_s3 + $0x248] sm:$0xff]  }
  0x17   : > { %367 = vmatpush1.bf16.msra.mxu0 %v2265_v5  ;;  %v2313_v14 = vld [vmem:[%s2989_s3 + $0x200] sm:$0xff]   ;;  %v2339_v52 = vld [vmem:[%s2989_s3 + $0x278] sm:$0xff]  }
  0x18   : > { %368 = vmatprep.subr.bf16.mxu0 %v2414_v1 }
  0x19   : > { %2085 = vmatpush3.bf16.msra.mxu1 %v2296_v21 }
  0x1a   : > { %2086 = vmatprep.subr.bf16.mxu1 %v2298_v23 }
  0x1b   : > { %369 = vmatpush1.bf16.msra.mxu0 %v2266_v9  ;;  %v433_v9 = vsub.s32 6, %v2621_v53 }
  0x1c   : > { %370 = vmatprep.subr.bf16.mxu0 %v2414_v1 }
  0x1d   : > { %2087 = vmatpush3.bf16.msra.mxu1 %v2300_v24 }
  0x1e   : > { %2088 = vmatprep.subr.bf16.mxu1 %v2302_v42  ;;  %v2329_v42 = vld [vmem:[%s2989_s3 + $0x220] sm:$0xff]  }
  0x1f   : > { %371 = vmatpush1.bf16.msra.mxu0 %v2267_v12 }
  0x20   : > { %372 = vmatprep.subr.bf16.mxu0 %v2414_v1 }
  0x21   : > { %2089 = vmatpush3.bf16.msra.mxu1 %v2304_v44  ;;  %v2331_v44 = vld [vmem:[%s2989_s3 + $0x268] sm:$0xff]  }
  0x22   : > { %2090 = vmatprep.subr.bf16.mxu1 %v2306_v46  ;;  %v2333_v46 = vld [vmem:[%s2989_s3 + $0x228] sm:$0xff]  }
  0x23   : > { %373 = vmatpush1.bf16.msra.mxu0 %v2268_v15 }
  0x24   : > { %374 = vmatprep.subr.bf16.mxu0 %v2414_v1 }
  0x25   : > { %2091 = vmatpush3.bf16.msra.mxu1 %v2308_v48  ;;  %v2335_v48 = vld [vmem:[%s2989_s3 + $0x270] sm:$0xff]  }
  0x26   : > { %2098 = vmatprep.subr.bf16.mxu1 %v2310_v50  ;;  %v2337_v50 = vld [vmem:[%s2989_s3 + $0x230] sm:$0xff]  }
  0x27   : > { %375 = vmatpush1.bf16.msra.mxu0 %v2269_v18  ;;  %v2314_v18 = vld [vmem:[%s2989_s3 + $0xc8] sm:$0xff]  }
  0x28   : > { %376 = vmatprep.subr.bf16.mxu0 %v2414_v1 }
  0x2b   : > { %377 = vmatpush1.bf16.msra.mxu0 %v2270_v20  ;;  %v413_v20 = vsub.s32 2, %v2621_v53  ;;  %v2346_v53 = vld [vmem:[%s2989_s3 + $0x1c8] sm:$0xff]  }
  0x2c   : > { %378 = vmatprep.subr.bf16.mxu0 %v2414_v1 }
  0x2f   : > { %379 = vmatpush1.bf16.msra.mxu0 %v2271_v25  ;;  %v2316_v25 = vld [vmem:[%s2989_s3 + $0x88] sm:$0xff]  }
  0x30   : > { %380 = vmatprep.subr.bf16.mxu0 %v2414_v1 }
  0x33   : > { %381 = vmatpush1.bf16.msra.mxu0 %v2272_v27 }
  0x34   : > { %382 = vmatprep.subr.bf16.mxu0 %v2414_v1 }
  0x37   : > { %383 = vmatpush1.bf16.msra.mxu0 %v2273_v28 }
  0x38   : > { %384 = vmatprep.subr.bf16.mxu0 %v2414_v1 }
  0x3b   : > { %385 = vmatpush1.bf16.msra.mxu0 %v356_v26  ;;  %v2317_v26 = vld [vmem:[%s2989_s3 + $0x208] sm:$0xff]  }
  0x3c   : > { %2120 = vmatprep.subr.bf16.mxu0 %v2279_v29  ;;  %v2318_v29 = vld [vmem:[%s2989_s3 + $0xd0] sm:$0xff]  }
  0x3e   : > { %391 = vmatmul.mubr.bf16.vlgmr.msra.gmra.mrb[0].mxu0 %v2275_v30  ;;  %v2319_v30 = vld [vmem:[%s2989_s3 + $0x250] sm:$0xff]  }
  0x3f   : > { %2121 = vmatpush3.bf16.msra.mxu0 %v2281_v31 }
  0x40   : > { %2122 = vmatprep.subr.bf16.mxu0 %v2283_v32 }
  0x43   : > { %2123 = vmatpush3.bf16.msra.mxu0 %v2285_v33  ;;  %v2320_v33 = vld [vmem:[%s2989_s3 + $0x90] sm:$0xff]  }
  0x44   : > { %2124 = vmatprep.subr.bf16.mxu0 %v2287_v34  ;;  %v2321_v34 = vld [vmem:[%s2989_s3 + $0x210] sm:$0xff]  }
  0x47   : > { %2125 = vmatpush3.bf16.msra.mxu0 %v2289_v35  ;;  %v2322_v35 = vld [vmem:[%s2989_s3 + $0xd8] sm:$0xff]  }
  0x48   : > { %2126 = vmatprep.subr.bf16.mxu0 %v2291_v36  ;;  %v2323_v36 = vld [vmem:[%s2989_s3 + $0x258] sm:$0xff]  }
  0x4b   : > { %2127 = vmatpush3.bf16.msra.mxu0 %v2293_v37  ;;  %v2324_v37 = vld [vmem:[%s2989_s3 + $0x98] sm:$0xff]  }
  0x4c   : > { %2128 = vmatprep.subr.bf16.mxu0 %v2295_v38  ;;  %v2325_v38 = vld [vmem:[%s2989_s3 + $0x218] sm:$0xff]  }
  0x4f   : > { %2129 = vmatpush3.bf16.msra.mxu0 %v2297_v39  ;;  %v2326_v39 = vld [vmem:[%s2989_s3 + $0xe0] sm:$0xff]  }
  0x50   : > { %2130 = vmatprep.subr.bf16.mxu0 %v2299_v40  ;;  %v2327_v40 = vld [vmem:[%s2989_s3 + $0x260] sm:$0xff]  }
  0x53   : > { %2131 = vmatpush3.bf16.msra.mxu0 %v2301_v41  ;;  %v2328_v41 = vld [vmem:[%s2989_s3 + $0xa0] sm:$0xff]  }
  0x54   : > { %2132 = vmatprep.subr.bf16.mxu0 %v2303_v43  ;;  %v2330_v43 = vld [vmem:[%s2989_s3 + $0xe8] sm:$0xff]  }
  0x57   : > { %2133 = vmatpush3.bf16.msra.mxu0 %v2305_v45  ;;  %v2332_v45 = vld [vmem:[%s2989_s3 + $0xa8] sm:$0xff]  }
  0x58   : > { %2134 = vmatprep.subr.bf16.mxu0 %v2307_v47  ;;  %v2334_v47 = vld [vmem:[%s2989_s3 + $0xf0] sm:$0xff]  }
  0x5b   : > { %2135 = vmatpush3.bf16.msra.mxu0 %v2309_v49  ;;  %v2336_v49 = vld [vmem:[%s2989_s3 + $0xb0] sm:$0xff]  }
  0x5c   : > { %2164 = vmatprep.subr.bf16.mxu0 %v2311_v51  ;;  %v2338_v51 = vld [vmem:[%s2989_s3 + $0xf8] sm:$0xff]  }
 0x111   : > { %v392_v55 = vpop.f32.mrb[0].mxu0 }
 0x112   : > { %v393_v56 = vadd.f32 %v1926_v54, %v392_v55  ;;  %v394_v57 = vpop.f32.mrb[1].mxu0  ;;  %v2341_v55 = vld [vmem:[%s2989_s3 + $0x238] sm:$0xff]  }
 0x113   : > { %v395_v61 = vpop.f32.mrb[2].mxu0  ;;  %v2342_v57 = vld [vmem:[%s2989_s3 + $0x1c0] sm:$0xff]  }
 0x114   : > { %v2631_v0 = vmax.f32 %v393_v56, 0.0  ;;  %v396_v1 = vadd.f32 %v1926_v54, %v395_v61  ;;  %v397_v2 = vpop.f32.mrb[3].mxu0  ;;  %v2340_v54 = vld [vmem:[%s2989_s3 + $0xb8] sm:$0xff]   ;;  %v2343_v61 = vld [vmem:[%s2989_s3 + $0x340] sm:$0xff]  }
 0x116   : > { %v2633_v3 = vmax.f32 %v396_v1, 0.0  ;;  %v409_v4 = vrot.slane %v2631_v0, %v408_v58  ;;  %v429_v5 = vrot.slane %v2631_v0, %v428_v59  ;;  %v404_v6 = vrot.slane %v2631_v0, %v403_v60  ;;  %v2344_v1 = vld [vmem:[%s2989_s3 + $0x180] sm:$0xff]  }
 0x117   : > { %v424_v7 = vrot.slane %v2631_v0, %v423_v62  ;;  %v419_v8 = vrot.slane %v2631_v0, %v418_v63  ;;  %v2661_v23 = vrot.slane %v2631_v0, %v433_v9  ;;  %v414_v56 = vrot.slane %v2631_v0, %v413_v20 }
 0x118   : > { %v498_v10 = vpack.c.bf16 %v409_v4, %v409_v4  ;;  %v502_v11 = vpack.c.bf16 %v429_v5, %v429_v5  ;;  %v497_v12 = vpack.c.bf16 %v404_v6, %v404_v6  ;;  %v449_v15 = vrot.slane %v2633_v3, %v408_v58  ;;  %v2345_v4 = vld [vmem:[%s2989_s3 + $0x300] sm:$0xff]   ;;  %v2349_v6 = vld [vmem:[%s2989_s3 + $0x308] sm:$0xff]  }
 0x119   : > { %v501_v16 = vpack.c.bf16 %v424_v7, %v424_v7  ;;  %v500_v21 = vpack.c.bf16 %v419_v8, %v419_v8  ;;  %v2664_v24 = vrot.slane %v2633_v3, %v423_v62  ;;  %v2673_v27 = vrot.slane %v2633_v3, %v418_v63  ;;  %v2350_v7 = vld [vmem:[%s2989_s3 + $0x1d0] sm:$0xff]  }
 0x11a   : > { %1576 = vmatprep.mubr.bf16.mxu1 %v498_v10  ;;  %1656 = vmatprep.mubr.bf16.mxu0 %v502_v11  ;;  %v506_v17 = vpack.c.bf16 %v449_v15, %v449_v15  ;;  %v2678_v28 = vrot.slane %v2633_v3, %v413_v20  ;;  %v2689_v31 = vrot.slane %v2633_v3, %v438_v22  ;;  %v2351_v8 = vld [vmem:[%s2989_s3 + $0x350] sm:$0xff]   ;;  %v2354_v11 = vld [vmem:[%s2989_s3 + $0x1d8] sm:$0xff]   ;;  %v2358_v15 = vld [vmem:[%s2989_s3 + $0x1e0] sm:$0xff]  }
 0x11b   : > { %1577 = vmatmul.mubr.bf16.vlgmr.msra.gmra.mrb[0].mxu1 %v497_v12  ;;  %1657 = vmatmul.mubr.bf16.vlgmr.msra.gmra.mrb[4].mxu0 %v501_v16  ;;  %v2692_v32 = vrot.slane %v2633_v3, %v433_v9  ;;  %v444_v58 = vrot.slane %v2633_v3, %v403_v60  ;;  %v439_v62 = vrot.slane %v2631_v0, %v438_v22  ;;  %v2352_v9 = vld [vmem:[%s2989_s3 + $0x190] sm:$0xff]   ;;  %v2355_v12 = vld [vmem:[%s2989_s3 + $0x358] sm:$0xff]   ;;  %v2359_v16 = vld [vmem:[%s2989_s3 + $0x360] sm:$0xff]  }
 0x11c   : > { %2099 = vmatpush3.bf16.msra.mxu1 %v2312_v13  ;;  %2165 = vmatpush3.bf16.msra.mxu0 %v2313_v14  ;;  %v469_v63 = vrot.slane %v2633_v3, %v428_v59  ;;  %v499_v2 = vpack.c.bf16 %v414_v56, %v414_v56  ;;  %v2347_v59 = vld [vmem:[%s2989_s3 + $0x348] sm:$0xff]   ;;  %v2353_v10 = vld [vmem:[%s2989_s3 + $0x310] sm:$0xff]   ;;  %v2356_v13 = vld [vmem:[%s2989_s3 + $0x198] sm:$0xff]   ;;  %v507_v56 = vpack.c.bf16 %v2678_v28, %v2678_v28 }
 0x11d   : > { %1616 = vmatprep.mubr.bf16.mxu1 %v500_v21  ;;  %1736 = vmatprep.mubr.bf16.mxu0 %v506_v17  ;;  %v505_v60 = vpack.c.bf16 %v444_v58, %v444_v58  ;;  %v504_v5 = vpack.c.bf16 %v439_v62, %v439_v62  ;;  %v2348_v3 = vld [vmem:[%s2989_s3 + $0x188] sm:$0xff]   ;;  %v2357_v14 = vld [vmem:[%s2989_s3 + $0x318] sm:$0xff]   ;;  %v2360_v17 = vld [vmem:[%s2989_s3 + $0x1a0] sm:$0xff]   ;;  %v512_v58 = vpack.c.bf16 %v2689_v31, %v2689_v31 }
 0x11e   : > { %2100 = vmatprep.subr.bf16.mxu1 %v2314_v18  ;;  %2166 = vmatprep.subr.bf16.mxu0 %v2315_v19  ;;  %v510_v0 = vpack.c.bf16 %v469_v63, %v469_v63  ;;  %v2361_v18 = vld [vmem:[%s2989_s3 + $0x320] sm:$0xff]   ;;  %v2362_v19 = vld [vmem:[%s2989_s3 + $0x1e8] sm:$0xff]   ;;  %v2394_v28 = vld [vmem:[%s2989_s3 + $0x3d0] sm:$0xff]  }
 0x11f   : > { %v2363_v20 = vld [vmem:[%s2989_s3 + $0x368] sm:$0xff]   ;;  %v2395_v62 = vld [vmem:[%s2989_s3 + $0x390] sm:$0xff]   ;;  %v2396_v31 = vld [vmem:[%s2989_s3 + $0x3d8] sm:$0xff]  }
 0x120   : > { %2101 = vmatpush3.bf16.msra.mxu1 %v2316_v25  ;;  %2167 = vmatpush3.bf16.msra.mxu0 %v2317_v26  ;;  %v2364_v21 = vld [vmem:[%s2989_s3 + $0x1a8] sm:$0xff]   ;;  %v2366_v25 = vld [vmem:[%s2989_s3 + $0x1f0] sm:$0xff]   ;;  %v2397_v63 = vld [vmem:[%s2989_s3 + $0x398] sm:$0xff]  }
 0x121   : > { %2102 = vmatprep.subr.bf16.mxu1 %v2318_v29  ;;  %2168 = vmatprep.subr.bf16.mxu0 %v2319_v30  ;;  %v2365_v22 = vld [vmem:[%s2989_s3 + $0x328] sm:$0xff]   ;;  %v2367_v26 = vld [vmem:[%s2989_s3 + $0x370] sm:$0xff]  }
 0x122   : > { %v2368_v29 = vld [vmem:[%s2989_s3 + $0x1b0] sm:$0xff]  }
 0x123   : > { %v2369_v30 = vld [vmem:[%s2989_s3 + $0x330] sm:$0xff]  }
 0x124   : > { %2103 = vmatpush3.bf16.msra.mxu1 %v2320_v33  ;;  %2169 = vmatpush3.bf16.msra.mxu0 %v2321_v34  ;;  %v2370_v33 = vld [vmem:[%s2989_s3 + $0x1f8] sm:$0xff]  }
 0x125   : > { %2104 = vmatprep.subr.bf16.mxu1 %v2322_v35  ;;  %2170 = vmatprep.subr.bf16.mxu0 %v2323_v36  ;;  %v2371_v34 = vld [vmem:[%s2989_s3 + $0x378] sm:$0xff]  }
 0x126   : > { %v2372_v35 = vld [vmem:[%s2989_s3 + $0x1b8] sm:$0xff]  }
 0x127   : > { %v2373_v36 = vld [vmem:[%s2989_s3 + $0x338] sm:$0xff]  }
 0x128   : > { %2105 = vmatpush3.bf16.msra.mxu1 %v2324_v37  ;;  %2171 = vmatpush3.bf16.msra.mxu0 %v2325_v38  ;;  %v2374_v37 = vld [vmem:[%s2989_s3 + $0x2c0] sm:$0xff]  }
 0x129   : > { %2106 = vmatprep.subr.bf16.mxu1 %v2326_v39  ;;  %2172 = vmatprep.subr.bf16.mxu0 %v2327_v40  ;;  %v2375_v38 = vld [vmem:[%s2989_s3 + $0x280] sm:$0xff]   ;;  %v503_v39 = vpack.c.bf16 %v2661_v23, %v2661_v23  ;;  %v2376_v40 = vld [vmem:[%s2989_s3 + $0x2c8] sm:$0xff]   ;;  %v2378_v23 = vld [vmem:[%s2989_s3 + $0x2d0] sm:$0xff]  }
 0x12c   : > { %2107 = vmatpush3.bf16.msra.mxu1 %v2328_v41  ;;  %2173 = vmatpush3.bf16.msra.mxu0 %v2329_v42  ;;  %v509_v41 = vpack.c.bf16 %v2664_v24, %v2664_v24  ;;  %v508_v42 = vpack.c.bf16 %v2673_v27, %v2673_v27  ;;  %v2379_v24 = vld [vmem:[%s2989_s3 + $0x290] sm:$0xff]   ;;  %v2380_v27 = vld [vmem:[%s2989_s3 + $0x2d8] sm:$0xff]  }
 0x12d   : > { %2108 = vmatprep.subr.bf16.mxu1 %v2330_v43  ;;  %2174 = vmatprep.subr.bf16.mxu0 %v2331_v44  ;;  %v2377_v43 = vld [vmem:[%s2989_s3 + $0x288] sm:$0xff]   ;;  %v2381_v44 = vld [vmem:[%s2989_s3 + $0x298] sm:$0xff]  }
 0x130   : > { %2109 = vmatpush3.bf16.msra.mxu1 %v2332_v45  ;;  %2175 = vmatpush3.bf16.msra.mxu0 %v2333_v46  ;;  %v2382_v45 = vld [vmem:[%s2989_s3 + $0x2e0] sm:$0xff]  }
 0x131   : > { %2110 = vmatprep.subr.bf16.mxu1 %v2334_v47  ;;  %2176 = vmatprep.subr.bf16.mxu0 %v2335_v48  ;;  %v2383_v46 = vld [vmem:[%s2989_s3 + $0x2a0] sm:$0xff]   ;;  %v2384_v47 = vld [vmem:[%s2989_s3 + $0x2e8] sm:$0xff]  }
 0x132   : > { %v2385_v48 = vld [vmem:[%s2989_s3 + $0x2a8] sm:$0xff]  }
 0x134   : > { %2111 = vmatpush3.bf16.msra.mxu1 %v2336_v49  ;;  %2177 = vmatpush3.bf16.msra.mxu0 %v2337_v50  ;;  %v2386_v49 = vld [vmem:[%s2989_s3 + $0x2f0] sm:$0xff]  }
 0x135   : > { %2112 = vmatprep.subr.bf16.mxu1 %v2338_v51  ;;  %2178 = vmatprep.subr.bf16.mxu0 %v2339_v52  ;;  %v2387_v50 = vld [vmem:[%s2989_s3 + $0x2b0] sm:$0xff]   ;;  %v2388_v51 = vld [vmem:[%s2989_s3 + $0x2f8] sm:$0xff]  }
 0x136   : > { %v2389_v52 = vld [vmem:[%s2989_s3 + $0x2b8] sm:$0xff]  }
 0x138   : > { %2113 = vmatpush3.bf16.msra.mxu1 %v2340_v54  ;;  %2179 = vmatpush3.bf16.msra.mxu0 %v2341_v55  ;;  %v2390_v54 = vld [vmem:[%s2989_s3 + $0x3c0] sm:$0xff]  }
 0x139   : > { %2142 = vmatprep.subr.bf16.mxu1 %v2342_v57  ;;  %2208 = vmatprep.subr.bf16.mxu0 %v2343_v61  ;;  %v2391_v55 = vld [vmem:[%s2989_s3 + $0x380] sm:$0xff]   ;;  %v2392_v57 = vld [vmem:[%s2989_s3 + $0x3c8] sm:$0xff]  }
 0x13a   : > { %v2393_v61 = vld [vmem:[%s2989_s3 + $0x388] sm:$0xff]  }
 0x13b   : > { %1617 = vmatmul.mubr.bf16.vlgmr.msra.gmra.mrb[4].mxu1 %v499_v2  ;;  %1737 = vmatmul.mubr.bf16.vlgmr.msra.gmra.mrb[8].mxu0 %v505_v60  ;;  %v2399_v2 = vld [vmem:[%s2989_s3 + $0x3a0] sm:$0xff]   ;;  %v2400_v60 = vld [vmem:[%s2989_s3 + $0x3e8] sm:$0xff]  }
 0x13c   : > { %2143 = vmatpush3.bf16.msra.mxu1 %v2344_v1  ;;  %1696 = vmatprep.mubr.bf16.mxu1 %v504_v5  ;;  %v2398_v1 = vld [vmem:[%s2989_s3 + $0x3e0] sm:$0xff]   ;;  %v2402_v5 = vld [vmem:[%s2989_s3 + $0x3f0] sm:$0xff]  }
 0x13d   : > { %2209 = vmatpush3.bf16.msra.mxu0 %v2345_v4  ;;  %1816 = vmatprep.mubr.bf16.mxu0 %v510_v0  ;;  %v2401_v4 = vld [vmem:[%s2989_s3 + $0x3a8] sm:$0xff]   ;;  %v2405_v0 = vld [vmem:[%s2989_s3 + $0x3b8] sm:$0xff]  }
 0x13e   : > { %2144 = vmatprep.subr.bf16.mxu1 %v2346_v53  ;;  %2210 = vmatprep.subr.bf16.mxu0 %v2347_v59  ;;  %v2403_v53 = vld [vmem:[%s2989_s3 + $0x3b0] sm:$0xff]   ;;  %v2404_v59 = vld [vmem:[%s2989_s3 + $0x3f8] sm:$0xff]  }
 0x140   : > { %2145 = vmatpush3.bf16.msra.mxu1 %v2348_v3  ;;  %v511_v3 = vpack.c.bf16 %v2692_v32, %v2692_v32 }
 0x141   : > { %2211 = vmatpush3.bf16.msra.mxu0 %v2349_v6  ;;  %2146 = vmatprep.subr.bf16.mxu1 %v2350_v7 }
 0x142   : > { %2212 = vmatprep.subr.bf16.mxu0 %v2351_v8 }
 0x144   : > { %2147 = vmatpush3.bf16.msra.mxu1 %v2352_v9 }
 0x145   : > { %2213 = vmatpush3.bf16.msra.mxu0 %v2353_v10  ;;  %2148 = vmatprep.subr.bf16.mxu1 %v2354_v11 }
 0x146   : > { %2214 = vmatprep.subr.bf16.mxu0 %v2355_v12 }
 0x148   : > { %2149 = vmatpush3.bf16.msra.mxu1 %v2356_v13 }
 0x149   : > { %2215 = vmatpush3.bf16.msra.mxu0 %v2357_v14  ;;  %2150 = vmatprep.subr.bf16.mxu1 %v2358_v15 }
 0x14a   : > { %2216 = vmatprep.subr.bf16.mxu0 %v2359_v16  ;;  %v1944_v16 = vld [vmem:[%s2990_s4] ss:$0 sm:$0xff] }
 0x14c   : > { %2151 = vmatpush3.bf16.msra.mxu1 %v2360_v17 }
 0x14d   : > { %2217 = vmatpush3.bf16.msra.mxu0 %v2361_v18  ;;  %2152 = vmatprep.subr.bf16.mxu1 %v2362_v19 }
 0x14e   : > { %2218 = vmatprep.subr.bf16.mxu0 %v2363_v20 }
 0x150   : > { %2153 = vmatpush3.bf16.msra.mxu1 %v2364_v21 }
 0x151   : > { %2219 = vmatpush3.bf16.msra.mxu0 %v2365_v22  ;;  %2154 = vmatprep.subr.bf16.mxu1 %v2366_v25 }
 0x152   : > { %2220 = vmatprep.subr.bf16.mxu0 %v2367_v26 }
 0x154   : > { %2155 = vmatpush3.bf16.msra.mxu1 %v2368_v29 }
 0x155   : > { %2221 = vmatpush3.bf16.msra.mxu0 %v2369_v30  ;;  %2156 = vmatprep.subr.bf16.mxu1 %v2370_v33 }
 0x156   : > { %2222 = vmatprep.subr.bf16.mxu0 %v2371_v34 }
 0x158   : > { %2157 = vmatpush3.bf16.msra.mxu1 %v2372_v35 }
 0x159   : > { %2223 = vmatpush3.bf16.msra.mxu0 %v2373_v36  ;;  %2186 = vmatprep.subr.bf16.mxu1 %v2374_v37 }
 0x15b   : > { %1697 = vmatmul.mubr.bf16.vlgmr.msra.gmra.mrb[8].mxu1 %v503_v39 }
 0x15c   : > { %1817 = vmatmul.mubr.bf16.vlgmr.msra.gmra.mrb[12].mxu0 %v509_v41  ;;  %2187 = vmatpush3.bf16.msra.mxu1 %v2375_v38 }
 0x15d   : > { %1776 = vmatprep.mubr.bf16.mxu1 %v508_v42  ;;  %2188 = vmatprep.subr.bf16.mxu1 %v2376_v40 }
 0x160   : > { %2189 = vmatpush3.bf16.msra.mxu1 %v2377_v43 }
 0x161   : > { %2190 = vmatprep.subr.bf16.mxu1 %v2378_v23 }
 0x164   : > { %2191 = vmatpush3.bf16.msra.mxu1 %v2379_v24 }
 0x165   : > { %2192 = vmatprep.subr.bf16.mxu1 %v2380_v27 }
 0x168   : > { %2193 = vmatpush3.bf16.msra.mxu1 %v2381_v44 }
 0x169   : > { %2194 = vmatprep.subr.bf16.mxu1 %v2382_v45 }
 0x16c   : > { %2195 = vmatpush3.bf16.msra.mxu1 %v2383_v46 }
 0x16d   : > { %2196 = vmatprep.subr.bf16.mxu1 %v2384_v47 }
 0x170   : > { %2197 = vmatpush3.bf16.msra.mxu1 %v2385_v48 }
 0x171   : > { %2198 = vmatprep.subr.bf16.mxu1 %v2386_v49 }
 0x174   : > { %2199 = vmatpush3.bf16.msra.mxu1 %v2387_v50 }
 0x175   : > { %2200 = vmatprep.subr.bf16.mxu1 %v2388_v51 }
 0x178   : > { %2201 = vmatpush3.bf16.msra.mxu1 %v2389_v52 }
 0x179   : > { %2230 = vmatprep.subr.bf16.mxu1 %v2390_v54 }
 0x17b   : > { %1777 = vmatmul.mubr.bf16.vlgmr.msra.gmra.mrb[12].mxu1 %v507_v56 }
 0x17c   : > { %2231 = vmatpush3.bf16.msra.mxu1 %v2391_v55  ;;  %1856 = vmatprep.mubr.bf16.mxu1 %v512_v58 }
 0x17d   : > { %2232 = vmatprep.subr.bf16.mxu1 %v2392_v57 }
 0x180   : > { %2233 = vmatpush3.bf16.msra.mxu1 %v2393_v61 }
 0x181   : > { %2234 = vmatprep.subr.bf16.mxu1 %v2394_v28 }
 0x184   : > { %2235 = vmatpush3.bf16.msra.mxu1 %v2395_v62 }
 0x185   : > { %2236 = vmatprep.subr.bf16.mxu1 %v2396_v31 }
 0x188   : > { %2237 = vmatpush3.bf16.msra.mxu1 %v2397_v63 }
 0x189   : > { %2238 = vmatprep.subr.bf16.mxu1 %v2398_v1 }
 0x18c   : > { %2239 = vmatpush3.bf16.msra.mxu1 %v2399_v2 }
 0x18d   : > { %2240 = vmatprep.subr.bf16.mxu1 %v2400_v60 }
 0x190   : > { %2241 = vmatpush3.bf16.msra.mxu1 %v2401_v4 }
 0x191   : > { %2242 = vmatprep.subr.bf16.mxu1 %v2402_v5 }
 0x194   : > { %2243 = vmatpush3.bf16.msra.mxu1 %v2403_v53 }
 0x195   : > { %2244 = vmatprep.subr.bf16.mxu1 %v2404_v59 }
 0x198   : > { %2245 = vmatpush3.bf16.msra.mxu1 %v2405_v0 }
 0x19b   : > { %1857 = vmatmul.mubr.bf16.vlgmr.msra.gmra.mrb[16].mxu1 %v511_v3 }
 0x1ee   : > { %v2092_v6 = vpop.f32.mrb[0].mxu1  ;;  %v2136_v7 = vpop.f32.mrb[4].mxu0 }
 0x1ef   : > { %v2093_v8 = vpop.f32.mrb[1].mxu1  ;;  %v2137_v9 = vpop.f32.mrb[5].mxu0 }
 0x1f0   : > { %v2094_v10 = vadd.f32 %v2093_v8, %v2092_v6  ;;  %v2138_v11 = vadd.f32 %v2137_v9, %v2136_v7  ;;  %v2095_v12 = vpop.f32.mrb[2].mxu1  ;;  %v2139_v13 = vpop.f32.mrb[6].mxu0 }
 0x1f1   : > { %v2096_v14 = vpop.f32.mrb[3].mxu1  ;;  %v2140_v15 = vpop.f32.mrb[7].mxu0 }
 0x1f2   : > { %v1579_v32 = vadd.f32 %v2094_v10, %v1944_v16 }
 0x20e   : > { %v2114_v17 = vpop.f32.mrb[4].mxu1  ;;  %v2180_v18 = vpop.f32.mrb[8].mxu0 }
 0x20f   : > { %v2115_v19 = vpop.f32.mrb[5].mxu1  ;;  %v2181_v20 = vpop.f32.mrb[9].mxu0 }
 0x210   : > { %v2116_v21 = vadd.f32 %v2115_v19, %v2114_v17  ;;  %v2182_v22 = vadd.f32 %v2181_v20, %v2180_v18  ;;  %v2117_v25 = vpop.f32.mrb[6].mxu1  ;;  %v2183_v26 = vpop.f32.mrb[10].mxu0 }
 0x211   : > { %v2118_v29 = vpop.f32.mrb[7].mxu1  ;;  %v2184_v30 = vpop.f32.mrb[11].mxu0 }
 0x212   : > { %v1619_v33 = vadd.f32 %v2116_v21, %v1579_v32 }
 0x214   : > { %v1659_v34 = vadd.f32 %v2138_v11, %v1619_v33 }
 0x22e   : > { %v2158_v35 = vpop.f32.mrb[8].mxu1 }
 0x22f   : > { %v2224_v36 = vpop.f32.mrb[12].mxu0  ;;  %v2159_v37 = vpop.f32.mrb[9].mxu1 }
 0x230   : > { %v2160_v38 = vadd.f32 %v2159_v37, %v2158_v35  ;;  %v2225_v39 = vpop.f32.mrb[13].mxu0  ;;  %v2161_v40 = vpop.f32.mrb[10].mxu1 }
 0x231   : > { %v2226_v41 = vadd.f32 %v2225_v39, %v2224_v36  ;;  %v2227_v42 = vpop.f32.mrb[14].mxu0  ;;  %v2162_v43 = vpop.f32.mrb[11].mxu1 }
 0x232   : > { %v1699_v23 = vadd.f32 %v2160_v38, %v1659_v34  ;;  %v2228_v24 = vpop.f32.mrb[15].mxu0 }
 0x234   : > { %v1739_v27 = vadd.f32 %v2182_v22, %v1699_v23 }
 0x24e   : > { %v2202_v44 = vpop.f32.mrb[12].mxu1 }
 0x24f   : > { %v2203_v45 = vpop.f32.mrb[13].mxu1 }
 0x250   : > { %v2204_v46 = vadd.f32 %v2203_v45, %v2202_v44  ;;  %v2205_v47 = vpop.f32.mrb[14].mxu1 }
 0x251   : > { %v2206_v48 = vpop.f32.mrb[15].mxu1 }
 0x252   : > { %v1779_v49 = vadd.f32 %v2204_v46, %v1739_v27 }
 0x254   : > { %v1819_v50 = vadd.f32 %v2226_v41, %v1779_v49 }
 0x26e   : > { %v2246_v51 = vpop.f32.mrb[16].mxu1 }
 0x26f   : > { %v2247_v52 = vpop.f32.mrb[17].mxu1 }
 0x270   : > { %v2248_v54 = vadd.f32 %v2247_v52, %v2246_v51  ;;  %v2249_v55 = vpop.f32.mrb[18].mxu1 }
 0x271   : > { %v2250_v56 = vpop.f32.mrb[19].mxu1 }
 0x272   : > { %v1859_v57 = vadd.f32 %v2248_v54, %v1819_v50 }
 0x274   : > { %1864 = vst [vmem:[%s222_s16] sm:$0xff] %v1859_v57 }
 0x275 PF: > { %s15_s18 = sadd.s32 1, %s2412_s18  }
 0x276   : > { %p12_p4 = scmp.ge.s32.totalorder %s15_s18, 4  }
 0x278   :  { %14 = sbr.rel (!%p12_p4) target bundleno = 1 (0x1), region = 70 }

</bundles_post_ra>
